<compile_context>
chip_gen: v6e
topology: v6e:2x2x1
jax: 0.10.0
libtpu: 0.0.40
codegen_flags: <defaults>
</compile_context>

<pallas_src>
import functools
import math

import jax
import jax.numpy as jnp
from jax.experimental import pallas as pl
from jax.experimental.pallas import tpu as pltpu

LANE = 128


def _poly_embed_kernel(shift_ref, corrupt_ref, p5_ref, vert_ref, poly_ref,
                       graph_ref, area_ref, t_ref, freqs_ref,
                       w_shift_ref, w_cp1_ref, w_cp5_ref, w_vert_ref,
                       w_poly_ref, w_graph_ref, w_area_ref,
                       w_t1c_ref, w_t1s_ref, b_t1_ref, w_t2p_ref, b_full_ref,
                       out_ref, *, compute_dtype):
    """One row tile -> lane-dense [rows, 4*O] slab (shift | cor | cond | time)."""
    f32 = jnp.float32
    cd = compute_dtype

    def sig(ref):
        # elementwise kept f32 (v5e has no bf16 VPU/EUP); cast only for the MXU
        return jax.nn.sigmoid(ref[...].astype(f32)).astype(cd)

    def mm(x, w_ref):
        return jnp.dot(x, w_ref[...], preferred_element_type=f32)

    # Block-diagonal embeddings: per-component accumulating dots (no feat concat,
    # no iota/where mask).  MXU has huge slack; the small-K pushes are free.
    acc = mm(shift_ref[...].astype(cd), w_shift_ref)          # cols 0:O
    acc += mm(corrupt_ref[...].astype(cd), w_cp1_ref)         # cols O:2O (p1 fold)
    acc += mm(p5_ref[...].astype(cd), w_cp5_ref)              # cols O:2O (p5 fold)
    acc += mm(sig(vert_ref), w_vert_ref)                      # cols O:2O
    acc += mm(sig(poly_ref), w_poly_ref)                      # cols O:2O
    acc += mm(sig(graph_ref), w_graph_ref)                    # cols 2O:3O
    # K=1 'areas' term as a VPU broadcast multiply (exact f32, no K=1 MXU push)
    acc += area_ref[...] * w_area_ref[...]                    # cols 2O:3O

    # Sinusoidal time embedding + MLP(Linear, SiLU, Linear); trig/SiLU stay f32.
    # cat([cos, sin]) folded into the two pre-split row-halves of W_t1.
    args = t_ref[...] * freqs_ref[...]                        # [rows, half] f32
    h = (mm(jnp.cos(args).astype(cd), w_t1c_ref)
         + mm(jnp.sin(args).astype(cd), w_t1s_ref)
         + b_t1_ref[...])
    h = h * jax.nn.sigmoid(h)                                 # SiLU, f32
    acc += mm(h.astype(cd), w_t2p_ref)                        # cols 3O:4O

    # Single unmasked lane-dense store of the whole slab.
    out_ref[...] = (acc + b_full_ref[...]).astype(out_ref.dtype)


def init_params(key, n_coords, max_n_polygons, max_n_vertices, out_channels):
    """Deterministic PyTorch-Linear-style init (uniform +/- 1/sqrt(fan_in))."""
    dims = {
        "in":   (n_coords + 2, out_channels),
        "cor":  (n_coords + 2 * 8 + max_n_vertices + max_n_polygons, out_channels),
        "cond": (max_n_polygons + 1, out_channels),
        "t1":   (out_channels, out_channels),
        "t2":   (out_channels, out_channels),
    }
    params = {}
    for k_rng, (name, (fi, fo)) in zip(jax.random.split(key, len(dims)), dims.items()):
        kw, kb = jax.random.split(k_rng)
        bound = 1.0 / math.sqrt(fi)
        params["w_" + name] = jax.random.uniform(kw, (fi, fo), jnp.float32, -bound, bound)
        params["b_" + name] = jax.random.uniform(kb, (1, fo), jnp.float32, -bound, bound)
    return params


def polygon_feature_embedding(params, shift, t, corrupt, edges,
                              vertice_inds, polygon_inds, graphs, areas,
                              out_channels, max_period=10000.0,
                              compute_dtype=jnp.bfloat16, out_dtype=jnp.bfloat16,
                              row_tile_cap=1024):
    B, N, _ = shift.shape
    O = out_channels
    half = O // 2
    # TODO(synk): odd out_channels zero-pad branch of timestep_embedding not handled
    # (out_channels is even here).
    nc = corrupt.shape[2]
    V = vertice_inds.shape[2]
    P = polygon_inds.shape[2]
    BN = B * N
    f32 = jnp.float32
    cd = compute_dtype
    three_o = 3 * O

    # ---- glue (XLA): data-dependent gather p5[b,n] = corrupt[b, edges[b,n,1]] ----
    # TODO(synk): could move in-kernel via scalar-prefetched edges at very large BN.
    idx = edges[:, :, 1].astype(jnp.int32)[:, :, None]
    p5 = jnp.take_along_axis(corrupt, idx, axis=1)

    # ---- layout plumbing only: [B,N,c] -> [BN,c] in the streaming dtype; NO concat
    def rows2d(x, dt):
        return x.astype(dt).reshape(BN, x.shape[2])

    shift2 = rows2d(shift, cd)
    corrupt2 = rows2d(corrupt, cd)
    p5_2 = rows2d(p5, cd)
    vert2 = rows2d(vertice_inds, cd)
    poly2 = rows2d(polygon_inds, cd)
    graph2 = rows2d(graphs, cd)
    area2 = rows2d(areas, f32)                                 # stays f32 (VPU term)
    t_rows = jnp.repeat(t.astype(f32).reshape(B, 1), N, axis=0)   # [BN, 1]

    # ---- fold the AU subdivision into the corrupt weights (exact algebra) ----
    # concat order (p1, p1_5, p2, p2_5, p3, p3_5, p4, p4_5, p5): pk = a_k*p1+(1-a_k)*p5
    a = jnp.array([1.0, 7 / 8, 3 / 4, 5 / 8, 1 / 2, 3 / 8, 1 / 4, 1 / 8, 0.0], f32)
    w_cor = params["w_cor"]
    w_au = w_cor[:9 * nc].reshape(9, nc, O)
    w_p1 = jnp.sum(a[:, None, None] * w_au, axis=0)
    w_p5 = jnp.sum((1.0 - a)[:, None, None] * w_au, axis=0)

    # ---- per-component row-blocks of the block-diagonal [*, 4*O] weight ----
    # (trace-time weight prep; in production these are precomputed once)
    def place(k, col0, w):
        return jnp.zeros((k, 4 * O), f32).at[:, col0:col0 + O].set(w)

    w_shift_b = place(nc + 2, 0, params["w_in"]).astype(cd)
    w_cp1_b = place(nc, O, w_p1).astype(cd)
    w_cp5_b = place(nc, O, w_p5).astype(cd)
    w_vert_b = place(V, O, w_cor[9 * nc:9 * nc + V]).astype(cd)
    w_poly_b = place(P, O, w_cor[9 * nc + V:9 * nc + V + P]).astype(cd)
    w_graph_b = place(P, 2 * O, params["w_cond"][:P]).astype(cd)
    w_area_b = place(1, 2 * O, params["w_cond"][P:P + 1])      # f32 (VPU multiply)
    w_t2p = place(O, three_o, params["w_t2"]).astype(cd)
    b_full = jnp.concatenate(
        [params["b_in"], params["b_cor"], params["b_cond"], params["b_t2"]], axis=-1)
    w_t1c = params["w_t1"][:half].astype(cd)                   # cos rows
    w_t1s = params["w_t1"][half:].astype(cd)                   # sin rows
    b_t1 = params["b_t1"]

    freqs = jnp.exp(
        -math.log(max_period) * jnp.arange(half, dtype=f32) / half).reshape(1, half)

    # ---- row tile + explicit VMEM budget (lane-padded, double-buffered) ----
    in_bytes = jnp.dtype(cd).itemsize
    out_bytes = jnp.dtype(out_dtype).itemsize
    row_tile = BN if BN <= row_tile_cap else row_tile_cap      # cap is a multiple of 8

    def lanes(c):
        return -(-c // LANE) * LANE

    per_row = (sum(lanes(c) for c in (nc + 2, nc, nc, V, P, P)) * in_bytes
               + 2 * lanes(1) * 4                              # areas + t (f32)
               + lanes(4 * O) * out_bytes)
    vmem_est = 2 * row_tile * per_row + (4 << 20)              # 2x buffers + weights/headroom
    vmem_limit = int(min(max(vmem_est, 16 << 20), 48 << 20))   # <= v7x per-TC physical

    grid = (pl.cdiv(BN, row_tile),)

    def row_spec(c):
        return pl.BlockSpec((row_tile, c), lambda i: (i, 0))

    def full_spec(r, c):
        return pl.BlockSpec((r, c), lambda i: (0, 0))

    kernel = functools.partial(_poly_embed_kernel, compute_dtype=cd)
    out = pl.pallas_call(
        kernel,
        out_shape=jax.ShapeDtypeStruct((BN, 4 * O), out_dtype),
        grid=grid,
        in_specs=[
            row_spec(nc + 2),          # shift
            row_spec(nc),              # corrupt (p1)
            row_spec(nc),              # p5
            row_spec(V),               # vertice_inds
            row_spec(P),               # polygon_inds
            row_spec(P),               # graphs
            row_spec(1),               # areas (f32)
            row_spec(1),               # t per row (f32)
            full_spec(1, half),        # freqs
            full_spec(nc + 2, 4 * O),  # resident weight row-blocks:
            full_spec(nc, 4 * O),
            full_spec(nc, 4 * O),
            full_spec(V, 4 * O),
            full_spec(P, 4 * O),
            full_spec(P, 4 * O),
            full_spec(1, 4 * O),       # w_area (f32)
            full_spec(half, O),        # W_t1 cos rows
            full_spec(half, O),        # W_t1 sin rows
            full_spec(1, O),           # b_t1
            full_spec(O, 4 * O),       # W_t2 (lane-padded)
            full_spec(1, 4 * O),       # fused bias
        ],
        out_specs=pl.BlockSpec((row_tile, 4 * O), lambda i: (i, 0)),
        compiler_params=pltpu.CompilerParams(
            dimension_semantics=("parallel",),
            vmem_limit_bytes=vmem_limit),
    )(shift2, corrupt2, p5_2, vert2, poly2, graph2, area2, t_rows, freqs,
      w_shift_b, w_cp1_b, w_cp5_b, w_vert_b, w_poly_b, w_graph_b, w_area_b,
      w_t1c, w_t1s, b_t1, w_t2p, b_full)

    # slice the lane-dense slab back into the module's four outputs (XLA plumbing)
    shift_emb = out[:, 0:O].reshape(B, N, O)
    cor_emb = out[:, O:2 * O].reshape(B, N, O)
    cond_emb = out[:, 2 * O:three_o].reshape(B, N, O)
    time_emb = out[:, three_o:].reshape(B, N, O)
    return shift_emb, cor_emb, cond_emb, time_emb


def reference(params, shift, t, corrupt, edges, vertice_inds, polygon_inds,
              graphs, areas, out_channels, max_period=10000.0):
    """Pure-JAX mirror of the PyTorch forward, at HIGHEST dot precision."""
    hp = jax.lax.Precision.HIGHEST

    def lin(x, w, b):
        return jnp.dot(x, w, precision=hp) + b

    shift_emb = lin(shift, params["w_in"], params["b_in"])
    B = corrupt.shape[0]
    p1 = corrupt
    p5 = corrupt[jnp.arange(B)[:, None], edges[:, :, 1].astype(jnp.int32)]
    p3 = (p1 + p5) / 2
    p2 = (p1 + p3) / 2
    p4 = (p3 + p5) / 2
    p1_5 = (p1 + p2) / 2
    p2_5 = (p2 + p3) / 2
    p3_5 = (p3 + p4) / 2
    p4_5 = (p4 + p5) / 2
    corrupt_x = jnp.concatenate((p1, p1_5, p2, p2_5, p3, p3_5, p4, p4_5, p5), axis=2)
    sig = jax.nn.sigmoid
    corrupt_total = jnp.concatenate(
        (corrupt_x, sig(vertice_inds), sig(polygon_inds)), axis=2)
    cor_emb = lin(corrupt_total, params["w_cor"], params["b_cor"])
    cond = jnp.concatenate((sig(graphs), areas), axis=2)
    cond_emb = lin(cond, params["w_cond"], params["b_cond"])
    half = out_channels // 2
    freqs = jnp.exp(-math.log(max_period) * jnp.arange(half, dtype=jnp.float32) / half)
    args = t.astype(jnp.float32)[:, None] * freqs[None]
    emb = jnp.concatenate([jnp.cos(args), jnp.sin(args)], axis=-1)
    h = jax.nn.silu(lin(emb, params["w_t1"], params["b_t1"]))
    te = lin(h, params["w_t2"], params["b_t2"])
    time_emb = jnp.broadcast_to(
        te[:, None, :], (shift_emb.shape[0], shift_emb.shape[1], out_channels))
    return shift_emb, cor_emb, cond_emb, time_emb


if __name__ == "__main__":
    n_coords, max_n_polygons, max_n_vertices, out_channels = 2, 8, 8, 32
    B, N = 2, 8

    keys = iter(jax.random.split(jax.random.PRNGKey(0), 16))
    params = init_params(next(keys), n_coords, max_n_polygons, max_n_vertices,
                         out_channels)

    shift = jax.random.normal(next(keys), (B, N, n_coords + 2), jnp.float32)
    t = jax.random.uniform(next(keys), (B,), jnp.float32, 0.0, 1000.0)
    corrupt = jax.random.normal(next(keys), (B, N, n_coords), jnp.float32)
    edges = jnp.stack(
        [jnp.broadcast_to(jnp.arange(N), (B, N)),
         jax.random.randint(next(keys), (B, N), 0, N)], axis=-1).astype(jnp.int32)
    vertice_inds = jax.random.normal(next(keys), (B, N, max_n_vertices), jnp.float32)
    polygon_inds = jax.random.normal(next(keys), (B, N, max_n_polygons), jnp.float32)
    graphs = jax.random.normal(next(keys), (B, N, max_n_polygons), jnp.float32)
    areas = jax.random.normal(next(keys), (B, N, 1), jnp.float32)

    refs = reference(params, shift, t, corrupt, edges, vertice_inds, polygon_inds,
                     graphs, areas, out_channels)
    names = ("shift_emb", "cor_emb", "cond_emb", "time_emb")

    # --- strict f32 path: catches structural regressions at ~f32 accuracy ---
    f32_fn = jax.jit(functools.partial(
        polygon_feature_embedding, out_channels=out_channels,
        compute_dtype=jnp.float32, out_dtype=jnp.float32))
    outs = jax.block_until_ready(
        f32_fn(params, shift, t, corrupt, edges, vertice_inds, polygon_inds,
               graphs, areas))
    tols = ((2e-5, 2e-5), (2e-5, 2e-5), (2e-5, 2e-5), (1e-3, 1e-3))
    for name, o, r, (rt, at) in zip(names, outs, refs, tols):
        assert o.shape == r.shape, (name, o.shape, r.shape)
        assert jnp.allclose(o, r, rtol=rt, atol=at), (
            "f32", name, float(jnp.max(jnp.abs(o - r))))

    # --- bandwidth-optimized bf16-in / bf16-out path (production config) ---
    bf16_fn = jax.jit(functools.partial(
        polygon_feature_embedding, out_channels=out_channels,
        compute_dtype=jnp.bfloat16, out_dtype=jnp.bfloat16))
    outs_bf = jax.block_until_ready(
        bf16_fn(params, shift, t, corrupt, edges, vertice_inds, polygon_inds,
                graphs, areas))
    for name, o, r in zip(names, outs_bf, refs):
        assert o.shape == r.shape, (name, o.shape, r.shape)
        d = jnp.abs(o.astype(jnp.float32) - r)
        assert jnp.allclose(o.astype(jnp.float32), r, rtol=5e-2, atol=1e-1), (
            "bf16", name, float(jnp.max(d)))

    print("KERNEL_OK")
</pallas_src>

<mosaic_0001>
module attributes {stable_mosaic.version = 11 : i64} {
  func.func @_poly_embed_kernel(%arg0: i32, %arg1: memref<16x4xf32, #tpu.memory_space<vmem>>, %arg2: memref<16x2xf32, #tpu.memory_space<vmem>>, %arg3: memref<16x2xf32, #tpu.memory_space<vmem>>, %arg4: memref<16x8xf32, #tpu.memory_space<vmem>>, %arg5: memref<16x8xf32, #tpu.memory_space<vmem>>, %arg6: memref<16x8xf32, #tpu.memory_space<vmem>>, %arg7: memref<16x1xf32, #tpu.memory_space<vmem>>, %arg8: memref<16x1xf32, #tpu.memory_space<vmem>>, %arg9: memref<1x16xf32, #tpu.memory_space<vmem>>, %arg10: memref<4x128xf32, #tpu.memory_space<vmem>>, %arg11: memref<2x128xf32, #tpu.memory_space<vmem>>, %arg12: memref<2x128xf32, #tpu.memory_space<vmem>>, %arg13: memref<8x128xf32, #tpu.memory_space<vmem>>, %arg14: memref<8x128xf32, #tpu.memory_space<vmem>>, %arg15: memref<8x128xf32, #tpu.memory_space<vmem>>, %arg16: memref<1x128xf32, #tpu.memory_space<vmem>>, %arg17: memref<16x32xf32, #tpu.memory_space<vmem>>, %arg18: memref<16x32xf32, #tpu.memory_space<vmem>>, %arg19: memref<1x32xf32, #tpu.memory_space<vmem>>, %arg20: memref<32x128xf32, #tpu.memory_space<vmem>>, %arg21: memref<1x128xf32, #tpu.memory_space<vmem>>, %arg22: memref<16x128xf32, #tpu.memory_space<vmem>>) attributes {dimension_semantics = [#tpu.dimension_semantics<parallel>], iteration_bounds = array<i64: 1>, scalar_prefetch = 0 : i64, scratch_operands = 0 : i64, tpu.core_type = #tpu.core_type<tc>, window_params = [{transform_indices = @transform_0, window_bounds = array<i64: 16, 4>}, {transform_indices = @transform_1, window_bounds = array<i64: 16, 2>}, {transform_indices = @transform_2, window_bounds = array<i64: 16, 2>}, {transform_indices = @transform_3, window_bounds = array<i64: 16, 8>}, {transform_indices = @transform_4, window_bounds = array<i64: 16, 8>}, {transform_indices = @transform_5, window_bounds = array<i64: 16, 8>}, {transform_indices = @transform_6, window_bounds = array<i64: 16, 1>}, {transform_indices = @transform_7, window_bounds = array<i64: 16, 1>}, {pipeline_mode = #tpu.pipeline_mode<synchronous>, transform_indices = @transform_8, window_bounds = array<i64: 1, 16>}, {pipeline_mode = #tpu.pipeline_mode<synchronous>, transform_indices = @transform_9, window_bounds = array<i64: 4, 128>}, {pipeline_mode = #tpu.pipeline_mode<synchronous>, transform_indices = @transform_10, window_bounds = array<i64: 2, 128>}, {pipeline_mode = #tpu.pipeline_mode<synchronous>, transform_indices = @transform_11, window_bounds = array<i64: 2, 128>}, {pipeline_mode = #tpu.pipeline_mode<synchronous>, transform_indices = @transform_12, window_bounds = array<i64: 8, 128>}, {pipeline_mode = #tpu.pipeline_mode<synchronous>, transform_indices = @transform_13, window_bounds = array<i64: 8, 128>}, {pipeline_mode = #tpu.pipeline_mode<synchronous>, transform_indices = @transform_14, window_bounds = array<i64: 8, 128>}, {pipeline_mode = #tpu.pipeline_mode<synchronous>, transform_indices = @transform_15, window_bounds = array<i64: 1, 128>}, {pipeline_mode = #tpu.pipeline_mode<synchronous>, transform_indices = @transform_16, window_bounds = array<i64: 16, 32>}, {pipeline_mode = #tpu.pipeline_mode<synchronous>, transform_indices = @transform_17, window_bounds = array<i64: 16, 32>}, {pipeline_mode = #tpu.pipeline_mode<synchronous>, transform_indices = @transform_18, window_bounds = array<i64: 1, 32>}, {pipeline_mode = #tpu.pipeline_mode<synchronous>, transform_indices = @transform_19, window_bounds = array<i64: 32, 128>}, {pipeline_mode = #tpu.pipeline_mode<synchronous>, transform_indices = @transform_20, window_bounds = array<i64: 1, 128>}, {transform_indices = @transform_21, window_bounds = array<i64: 16, 128>}]} {
    %c0 = arith.constant 0 : index
    %c0_0 = arith.constant 0 : index
    %0 = vector.load %arg1[%c0, %c0_0] : memref<16x4xf32, #tpu.memory_space<vmem>>, vector<16x4xf32>
    %c0_1 = arith.constant 0 : index
    %c0_2 = arith.constant 0 : index
    %1 = vector.load %arg10[%c0_1, %c0_2] : memref<4x128xf32, #tpu.memory_space<vmem>>, vector<4x128xf32>
    %cst = arith.constant dense<0.000000e+00> : vector<16x128xf32>
    %2 = tpu.matmul %0, %1, %cst {dimension_numbers = #tpu.dot_dimension_numbers<[1], [0], [0], [1], [0, 0, 1, 1], [], []>} : vector<16x4xf32>, vector<4x128xf32>, vector<16x128xf32> -> vector<16x128xf32>
    %c0_3 = arith.constant 0 : index
    %c0_4 = arith.constant 0 : index
    %3 = vector.load %arg2[%c0_3, %c0_4] : memref<16x2xf32, #tpu.memory_space<vmem>>, vector<16x2xf32>
    %c0_5 = arith.constant 0 : index
    %c0_6 = arith.constant 0 : index
    %4 = vector.load %arg11[%c0_5, %c0_6] : memref<2x128xf32, #tpu.memory_space<vmem>>, vector<2x128xf32>
    %cst_7 = arith.constant dense<0.000000e+00> : vector<16x128xf32>
    %5 = tpu.matmul %3, %4, %cst_7 {dimension_numbers = #tpu.dot_dimension_numbers<[1], [0], [0], [1], [0, 0, 1, 1], [], []>} : vector<16x2xf32>, vector<2x128xf32>, vector<16x128xf32> -> vector<16x128xf32>
    %6 = arith.addf %2, %5 : vector<16x128xf32>
    %c0_8 = arith.constant 0 : index
    %c0_9 = arith.constant 0 : index
    %7 = vector.load %arg3[%c0_8, %c0_9] : memref<16x2xf32, #tpu.memory_space<vmem>>, vector<16x2xf32>
    %c0_10 = arith.constant 0 : index
    %c0_11 = arith.constant 0 : index
    %8 = vector.load %arg12[%c0_10, %c0_11] : memref<2x128xf32, #tpu.memory_space<vmem>>, vector<2x128xf32>
    %cst_12 = arith.constant dense<0.000000e+00> : vector<16x128xf32>
    %9 = tpu.matmul %7, %8, %cst_12 {dimension_numbers = #tpu.dot_dimension_numbers<[1], [0], [0], [1], [0, 0, 1, 1], [], []>} : vector<16x2xf32>, vector<2x128xf32>, vector<16x128xf32> -> vector<16x128xf32>
    %10 = arith.addf %6, %9 : vector<16x128xf32>
    %c0_13 = arith.constant 0 : index
    %c0_14 = arith.constant 0 : index
    %11 = vector.load %arg4[%c0_13, %c0_14] : memref<16x8xf32, #tpu.memory_space<vmem>>, vector<16x8xf32>
    %12 = arith.negf %11 : vector<16x8xf32>
    %13 = math.exp %12 : vector<16x8xf32>
    %cst_15 = arith.constant 1.000000e+00 : f32
    %14 = vector.broadcast %cst_15 : f32 to vector<16x8xf32>
    %15 = arith.addf %14, %13 : vector<16x8xf32>
    %16 = arith.divf %14, %15 : vector<16x8xf32>
    %c0_16 = arith.constant 0 : index
    %c0_17 = arith.constant 0 : index
    %17 = vector.load %arg13[%c0_16, %c0_17] : memref<8x128xf32, #tpu.memory_space<vmem>>, vector<8x128xf32>
    %cst_18 = arith.constant dense<0.000000e+00> : vector<16x128xf32>
    %18 = tpu.matmul %16, %17, %cst_18 {dimension_numbers = #tpu.dot_dimension_numbers<[1], [0], [0], [1], [0, 0, 1, 1], [], []>} : vector<16x8xf32>, vector<8x128xf32>, vector<16x128xf32> -> vector<16x128xf32>
    %19 = arith.addf %10, %18 : vector<16x128xf32>
    %c0_19 = arith.constant 0 : index
    %c0_20 = arith.constant 0 : index
    %20 = vector.load %arg5[%c0_19, %c0_20] : memref<16x8xf32, #tpu.memory_space<vmem>>, vector<16x8xf32>
    %21 = arith.negf %20 : vector<16x8xf32>
    %22 = math.exp %21 : vector<16x8xf32>
    %cst_21 = arith.constant 1.000000e+00 : f32
    %23 = vector.broadcast %cst_21 : f32 to vector<16x8xf32>
    %24 = arith.addf %23, %22 : vector<16x8xf32>
    %25 = arith.divf %23, %24 : vector<16x8xf32>
    %c0_22 = arith.constant 0 : index
    %c0_23 = arith.constant 0 : index
    %26 = vector.load %arg14[%c0_22, %c0_23] : memref<8x128xf32, #tpu.memory_space<vmem>>, vector<8x128xf32>
    %cst_24 = arith.constant dense<0.000000e+00> : vector<16x128xf32>
    %27 = tpu.matmul %25, %26, %cst_24 {dimension_numbers = #tpu.dot_dimension_numbers<[1], [0], [0], [1], [0, 0, 1, 1], [], []>} : vector<16x8xf32>, vector<8x128xf32>, vector<16x128xf32> -> vector<16x128xf32>
    %28 = arith.addf %19, %27 : vector<16x128xf32>
    %c0_25 = arith.constant 0 : index
    %c0_26 = arith.constant 0 : index
    %29 = vector.load %arg6[%c0_25, %c0_26] : memref<16x8xf32, #tpu.memory_space<vmem>>, vector<16x8xf32>
    %30 = arith.negf %29 : vector<16x8xf32>
    %31 = math.exp %30 : vector<16x8xf32>
    %cst_27 = arith.constant 1.000000e+00 : f32
    %32 = vector.broadcast %cst_27 : f32 to vector<16x8xf32>
    %33 = arith.addf %32, %31 : vector<16x8xf32>
    %34 = arith.divf %32, %33 : vector<16x8xf32>
    %c0_28 = arith.constant 0 : index
    %c0_29 = arith.constant 0 : index
    %35 = vector.load %arg15[%c0_28, %c0_29] : memref<8x128xf32, #tpu.memory_space<vmem>>, vector<8x128xf32>
    %cst_30 = arith.constant dense<0.000000e+00> : vector<16x128xf32>
    %36 = tpu.matmul %34, %35, %cst_30 {dimension_numbers = #tpu.dot_dimension_numbers<[1], [0], [0], [1], [0, 0, 1, 1], [], []>} : vector<16x8xf32>, vector<8x128xf32>, vector<16x128xf32> -> vector<16x128xf32>
    %37 = arith.addf %28, %36 : vector<16x128xf32>
    %c0_31 = arith.constant 0 : index
    %c0_32 = arith.constant 0 : index
    %38 = vector.load %arg7[%c0_31, %c0_32] : memref<16x1xf32, #tpu.memory_space<vmem>>, vector<16x1xf32>
    %c0_33 = arith.constant 0 : index
    %c0_34 = arith.constant 0 : index
    %39 = vector.load %arg16[%c0_33, %c0_34] : memref<1x128xf32, #tpu.memory_space<vmem>>, vector<1x128xf32>
    %40 = vector.broadcast %38 : vector<16x1xf32> to vector<16x128xf32>
    %41 = vector.broadcast %39 : vector<1x128xf32> to vector<16x128xf32>
    %42 = arith.mulf %40, %41 : vector<16x128xf32>
    %43 = arith.addf %37, %42 : vector<16x128xf32>
    %c0_35 = arith.constant 0 : index
    %c0_36 = arith.constant 0 : index
    %44 = vector.load %arg8[%c0_35, %c0_36] : memref<16x1xf32, #tpu.memory_space<vmem>>, vector<16x1xf32>
    %c0_37 = arith.constant 0 : index
    %c0_38 = arith.constant 0 : index
    %45 = vector.load %arg9[%c0_37, %c0_38] : memref<1x16xf32, #tpu.memory_space<vmem>>, vector<1x16xf32>
    %46 = vector.broadcast %44 : vector<16x1xf32> to vector<16x16xf32>
    %47 = vector.broadcast %45 : vector<1x16xf32> to vector<16x16xf32>
    %48 = arith.mulf %46, %47 : vector<16x16xf32>
    %49 = math.cos %48 : vector<16x16xf32>
    %c0_39 = arith.constant 0 : index
    %c0_40 = arith.constant 0 : index
    %50 = vector.load %arg17[%c0_39, %c0_40] : memref<16x32xf32, #tpu.memory_space<vmem>>, vector<16x32xf32>
    %cst_41 = arith.constant dense<0.000000e+00> : vector<16x32xf32>
    %51 = tpu.matmul %49, %50, %cst_41 {dimension_numbers = #tpu.dot_dimension_numbers<[1], [0], [0], [1], [0, 0, 1, 1], [], []>} : vector<16x16xf32>, vector<16x32xf32>, vector<16x32xf32> -> vector<16x32xf32>
    %52 = math.sin %48 : vector<16x16xf32>
    %c0_42 = arith.constant 0 : index
    %c0_43 = arith.constant 0 : index
    %53 = vector.load %arg18[%c0_42, %c0_43] : memref<16x32xf32, #tpu.memory_space<vmem>>, vector<16x32xf32>
    %cst_44 = arith.constant dense<0.000000e+00> : vector<16x32xf32>
    %54 = tpu.matmul %52, %53, %cst_44 {dimension_numbers = #tpu.dot_dimension_numbers<[1], [0], [0], [1], [0, 0, 1, 1], [], []>} : vector<16x16xf32>, vector<16x32xf32>, vector<16x32xf32> -> vector<16x32xf32>
    %55 = arith.addf %51, %54 : vector<16x32xf32>
    %c0_45 = arith.constant 0 : index
    %c0_46 = arith.constant 0 : index
    %56 = vector.load %arg19[%c0_45, %c0_46] : memref<1x32xf32, #tpu.memory_space<vmem>>, vector<1x32xf32>
    %57 = vector.broadcast %56 : vector<1x32xf32> to vector<16x32xf32>
    %58 = arith.addf %55, %57 : vector<16x32xf32>
    %59 = arith.negf %58 : vector<16x32xf32>
    %60 = math.exp %59 : vector<16x32xf32>
    %cst_47 = arith.constant 1.000000e+00 : f32
    %61 = vector.broadcast %cst_47 : f32 to vector<16x32xf32>
    %62 = arith.addf %61, %60 : vector<16x32xf32>
    %63 = arith.divf %61, %62 : vector<16x32xf32>
    %64 = arith.mulf %58, %63 : vector<16x32xf32>
    %c0_48 = arith.constant 0 : index
    %c0_49 = arith.constant 0 : index
    %65 = vector.load %arg20[%c0_48, %c0_49] : memref<32x128xf32, #tpu.memory_space<vmem>>, vector<32x128xf32>
    %cst_50 = arith.constant dense<0.000000e+00> : vector<16x128xf32>
    %66 = tpu.matmul %64, %65, %cst_50 {dimension_numbers = #tpu.dot_dimension_numbers<[1], [0], [0], [1], [0, 0, 1, 1], [], []>} : vector<16x32xf32>, vector<32x128xf32>, vector<16x128xf32> -> vector<16x128xf32>
    %67 = arith.addf %43, %66 : vector<16x128xf32>
    %c0_51 = arith.constant 0 : index
    %c0_52 = arith.constant 0 : index
    %68 = vector.load %arg21[%c0_51, %c0_52] : memref<1x128xf32, #tpu.memory_space<vmem>>, vector<1x128xf32>
    %69 = vector.broadcast %68 : vector<1x128xf32> to vector<16x128xf32>
    %70 = arith.addf %67, %69 : vector<16x128xf32>
    %c0_53 = arith.constant 0 : index
    %c0_54 = arith.constant 0 : index
    %71 = vector.load %arg22[%c0_53, %c0_54] : memref<16x128xf32, #tpu.memory_space<vmem>>, vector<16x128xf32>
    tpu.vector_store %arg22[%c0_53, %c0_54], %70 {strides = array<i32>} : memref<16x128xf32, #tpu.memory_space<vmem>>, vector<16x128xf32>,
    return
  }
  func.func @transform_0(%arg0: i32) -> (i32, i32) {
    %c0_i32 = arith.constant 0 : i32
    %c0_i32_0 = arith.constant 0 : i32
    return %arg0, %c0_i32 : i32, i32
  }
  func.func @transform_1(%arg0: i32) -> (i32, i32) {
    %c0_i32 = arith.constant 0 : i32
    %c0_i32_0 = arith.constant 0 : i32
    return %arg0, %c0_i32 : i32, i32
  }
  func.func @transform_2(%arg0: i32) -> (i32, i32) {
    %c0_i32 = arith.constant 0 : i32
    %c0_i32_0 = arith.constant 0 : i32
    return %arg0, %c0_i32 : i32, i32
  }
  func.func @transform_3(%arg0: i32) -> (i32, i32) {
    %c0_i32 = arith.constant 0 : i32
    %c0_i32_0 = arith.constant 0 : i32
    return %arg0, %c0_i32 : i32, i32
  }
  func.func @transform_4(%arg0: i32) -> (i32, i32) {
    %c0_i32 = arith.constant 0 : i32
    %c0_i32_0 = arith.constant 0 : i32
    return %arg0, %c0_i32 : i32, i32
  }
  func.func @transform_5(%arg0: i32) -> (i32, i32) {
    %c0_i32 = arith.constant 0 : i32
    %c0_i32_0 = arith.constant 0 : i32
    return %arg0, %c0_i32 : i32, i32
  }
  func.func @transform_6(%arg0: i32) -> (i32, i32) {
    %c0_i32 = arith.constant 0 : i32
    %c0_i32_0 = arith.constant 0 : i32
    return %arg0, %c0_i32 : i32, i32
  }
  func.func @transform_7(%arg0: i32) -> (i32, i32) {
    %c0_i32 = arith.constant 0 : i32
    %c0_i32_0 = arith.constant 0 : i32
    return %arg0, %c0_i32 : i32, i32
  }
  func.func @transform_8(%arg0: i32) -> (i32, i32) {
    %c0_i32 = arith.constant 0 : i32
    %c0_i32_0 = arith.constant 0 : i32
    %c0_i32_1 = arith.constant 0 : i32
    return %c0_i32, %c0_i32_0 : i32, i32
  }
  func.func @transform_9(%arg0: i32) -> (i32, i32) {
    %c0_i32 = arith.constant 0 : i32
    %c0_i32_0 = arith.constant 0 : i32
    %c0_i32_1 = arith.constant 0 : i32
    return %c0_i32, %c0_i32_0 : i32, i32
  }
  func.func @transform_10(%arg0: i32) -> (i32, i32) {
    %c0_i32 = arith.constant 0 : i32
    %c0_i32_0 = arith.constant 0 : i32
    %c0_i32_1 = arith.constant 0 : i32
    return %c0_i32, %c0_i32_0 : i32, i32
  }
  func.func @transform_11(%arg0: i32) -> (i32, i32) {
    %c0_i32 = arith.constant 0 : i32
    %c0_i32_0 = arith.constant 0 : i32
    %c0_i32_1 = arith.constant 0 : i32
    return %c0_i32, %c0_i32_0 : i32, i32
  }
  func.func @transform_12(%arg0: i32) -> (i32, i32) {
    %c0_i32 = arith.constant 0 : i32
    %c0_i32_0 = arith.constant 0 : i32
    %c0_i32_1 = arith.constant 0 : i32
    return %c0_i32, %c0_i32_0 : i32, i32
  }
  func.func @transform_13(%arg0: i32) -> (i32, i32) {
    %c0_i32 = arith.constant 0 : i32
    %c0_i32_0 = arith.constant 0 : i32
    %c0_i32_1 = arith.constant 0 : i32
    return %c0_i32, %c0_i32_0 : i32, i32
  }
  func.func @transform_14(%arg0: i32) -> (i32, i32) {
    %c0_i32 = arith.constant 0 : i32
    %c0_i32_0 = arith.constant 0 : i32
    %c0_i32_1 = arith.constant 0 : i32
    return %c0_i32, %c0_i32_0 : i32, i32
  }
  func.func @transform_15(%arg0: i32) -> (i32, i32) {
    %c0_i32 = arith.constant 0 : i32
    %c0_i32_0 = arith.constant 0 : i32
    %c0_i32_1 = arith.constant 0 : i32
    return %c0_i32, %c0_i32_0 : i32, i32
  }
  func.func @transform_16(%arg0: i32) -> (i32, i32) {
    %c0_i32 = arith.constant 0 : i32
    %c0_i32_0 = arith.constant 0 : i32
    %c0_i32_1 = arith.constant 0 : i32
    return %c0_i32, %c0_i32_0 : i32, i32
  }
  func.func @transform_17(%arg0: i32) -> (i32, i32) {
    %c0_i32 = arith.constant 0 : i32
    %c0_i32_0 = arith.constant 0 : i32
    %c0_i32_1 = arith.constant 0 : i32
    return %c0_i32, %c0_i32_0 : i32, i32
  }
  func.func @transform_18(%arg0: i32) -> (i32, i32) {
    %c0_i32 = arith.constant 0 : i32
    %c0_i32_0 = arith.constant 0 : i32
    %c0_i32_1 = arith.constant 0 : i32
    return %c0_i32, %c0_i32_0 : i32, i32
  }
  func.func @transform_19(%arg0: i32) -> (i32, i32) {
    %c0_i32 = arith.constant 0 : i32
    %c0_i32_0 = arith.constant 0 : i32
    %c0_i32_1 = arith.constant 0 : i32
    return %c0_i32, %c0_i32_0 : i32, i32
  }
  func.func @transform_20(%arg0: i32) -> (i32, i32) {
    %c0_i32 = arith.constant 0 : i32
    %c0_i32_0 = arith.constant 0 : i32
    %c0_i32_1 = arith.constant 0 : i32
    return %c0_i32, %c0_i32_0 : i32, i32
  }
  func.func @transform_21(%arg0: i32) -> (i32, i32) {
    %c0_i32 = arith.constant 0 : i32
    %c0_i32_0 = arith.constant 0 : i32
    return %arg0, %c0_i32 : i32, i32
  }
}

</mosaic_0001>

<bundles_post_ra>
// kernel: polygon_feature_embedding.1
= control target key start
LH: loop header
LB: loop body
LE: loop exit
PB: predicated region body
PF: predicated region fallthrough
CT: control target
= control target key end

     0   :  { %v1574_v0 = vmov 0   ;;  %vm81_vm0 = vcmask 1041408   ;;  %vm74_vm1 = vcmask 15360   ;;  %vm167_vm2 = vcmask 1043456   ;;  %s1879_s7 = inlined_call_operand.vmem [shape: f32[16,1], index: 7, kind: input, shape index: {}]   ;;  %s1880_s3 = inlined_call_operand.vmem [shape: f32[16,8], index: 3, kind: input, shape index: {}]   ;;  %s1881_s4 = inlined_call_operand.vmem [shape: f32[16,8], index: 4, kind: input, shape index: {}]   ;;  %s1882_s5 = inlined_call_operand.vmem [shape: f32[16,8], index: 5, kind: input, shape index: {}]   ;;  %s1883_s10 = inlined_call_operand.vmem [shape: f32[2,128], index: 10, kind: input, shape index: {}]   ;;  %s1884_s1 = inlined_call_operand.vmem [shape: f32[16,2], index: 1, kind: input, shape index: {}]   ;;  %s1885_s9 = inlined_call_operand.vmem [shape: f32[4,128], index: 9, kind: input, shape index: {}]   ;;  %s1886_s0 = inlined_call_operand.vmem [shape: f32[16,4], index: 0, kind: input, shape index: {}]   ;;  %s1887_s11 = inlined_call_operand.vmem [shape: f32[2,128], index: 11, kind: input, shape index: {}]   ;;  %s1888_s2 = inlined_call_operand.vmem [shape: f32[16,2], index: 2, kind: input, shape index: {}]   ;;  %s1889_s12 = inlined_call_operand.vmem [shape: f32[8,128], index: 12, kind: input, shape index: {}]   ;;  %s1890_s13 = inlined_call_operand.vmem [shape: f32[8,128], index: 13, kind: input, shape index: {}]   ;;  %s1891_s14 = inlined_call_operand.vmem [shape: f32[8,128], index: 14, kind: input, shape index: {}]   ;;  %s1892_s17 = inlined_call_operand.vmem [shape: f32[16,32], index: 17, kind: input, shape index: {}]   ;;  %s1893_s16 = inlined_call_operand.vmem [shape: f32[16,32], index: 16, kind: input, shape index: {}]   ;;  %s1894_s6 = inlined_call_operand.vmem [shape: f32[16,1], index: 6, kind: input, shape index: {}]   ;;  %s1895_s8 = inlined_call_operand.vmem [shape: f32[1,16], index: 8, kind: input, shape index: {}]   ;;  %s1896_s19 = inlined_call_operand.vmem [shape: f32[32,128], index: 19, kind: input, shape index: {}]   ;;  %s1897_s18 = inlined_call_operand.vmem [shape: f32[1,32], index: 18, kind: input, shape index: {}]   ;;  %s1898_s15 = inlined_call_operand.vmem [shape: f32[1,128], index: 15, kind: input, shape index: {}]   ;;  %s1899_s20 = inlined_call_operand.vmem [shape: f32[1,128], index: 20, kind: input, shape index: {}]   ;;  %s1900_s21 = inlined_call_operand.vmem [shape: f32[16,128], index: 21, kind: output, shape index: {}]  }
   0x1   :  { %1906 = sst [smem:[#allocation2_spill]] %s1879_s7  ;;  %1532 = vset.pattern.permute.xlu0 %v1574_v0  ;;  %1533 = vset.pattern.permute.xlu1 %v1574_v0  ;;  %vm160_vm3 = vcmask 31744   ;;  %v70_v30 = vld [vmem:[%s1885_s9] sm:$0xf]  ;;  %v69_v32 = vld [vmem:[%s1886_s0 + $0x8] sm:$0xff]  ;;  %vm350_vm4 = vcmask 64512  }
   0x2   :  { %1907 = sst [smem:[#allocation3_spill]] %s1880_s3  ;;  %v68_v31 = vld [vmem:[%s1886_s0] sm:$0xff]  ;;  %v247_v35 = vld [vmem:[%s1888_s2 + $0x8] sm:$0xff] }
   0x3   :  { %1908 = sst [smem:[#allocation4_spill]] %s1881_s4  ;;  %v248_v33 = vld [vmem:[%s1887_s11] sm:$0x3]  ;;  %v1091_v42 = vld [vmem:[%s1892_s17 + $0x8] sm:$0xff] }
   0x4   :  { %1909 = sst [smem:[#allocation5_spill]] %s1882_s5  ;;  %v246_v34 = vld [vmem:[%s1888_s2] sm:$0xff]  ;;  %1472 = vmatprep.subr.msk.mxu0 %vm81_vm0, %v248_v33  ;;  %v881_v44 = vld [vmem:[%s1893_s16 + $0x8] sm:$0xff] }
   0x5   :  { %1910 = sst [smem:[#allocation6_spill]] %s1883_s10  ;;  %v349_v36 = vld [vmem:[%s1889_s12] sm:$0xff]  ;;  %1473 = vmatpush3.msk.msra.mxu0 %vm81_vm0, %v248_v33  ;;  %1474 = vmatprep.mubr.msk.f32.mxu0 %vm74_vm1, %v246_v34  ;;  %v631_v50 = vld [vmem:[%s1894_s6 + $0x8] sm:$0xff] }
   0x6   :  { %1911 = sst [smem:[#allocation7_spill]] %s1884_s1  ;;  %v448_v37 = vld [vmem:[%s1890_s13] sm:$0xff]  ;;  %1475 = vmatmul.mubr.msk.f32.vlgmr.msra.gmra.mxu0 %vm74_vm1, %v247_v35 }
   0x7   :  { %s1912_s26 = sld [smem:[#allocation2_spill]]  ;;  %v546_v39 = vld [vmem:[%s1891_s14] sm:$0xff]  ;;  %1482 = vmatprep.subr.mxu0 %v448_v37 }
   0x8   :  { %s1913_s7 = sld [smem:[#allocation3_spill]]  ;;  %1483 = vmatpush3.msra.mxu0 %v448_v37  ;;  %v1090_v47 = vld [vmem:[%s1892_s17] sm:$0xff] }
   0x9   :  { %s1914_s23 = sld [smem:[#allocation4_spill]]  ;;  %1492 = vmatprep.subr.mxu0 %v1091_v42  ;;  %v880_v48 = vld [vmem:[%s1893_s16] sm:$0xff] }
   0xa   :  { %s1917_s1 = sld [smem:[#allocation7_spill]]  ;;  %v630_v49 = vld [vmem:[%s1894_s6] sm:$0xff] }
   0xb   :  { %635 = vperm.xlu1 %1533, %v630_v49   ;;  %v1403_v51 = vld [vmem:[%s1895_s8] ss:$0 sm:$0xff] }
   0xd   :  { %v653_v1 = vld [vmem:[%s1912_s26] sm:$0xff]  ;;  %v654_v2 = vld [vmem:[%s1912_s26 + $0x8] sm:$0xff]  ;;  %s1915_s26 = sld [smem:[#allocation5_spill]] }
   0xe   :  { %658 = vperm.xlu0 %1532, %v653_v1   ;;  %v335_v3 = vld [vmem:[%s1913_s7] sm:$0xff]  ;;  %v336_v4 = vld [vmem:[%s1913_s7 + $0x8] sm:$0xff]  ;;  %s1916_s7 = sld [smem:[#allocation6_spill]] }
   0xf   :  { %v1390_v5 = vmul.f32 -1.442695, %v335_v3  ;;  %v1391_v6 = vmul.f32 -1.442695, %v336_v4  ;;  %v434_v7 = vld [vmem:[%s1914_s23] sm:$0xff]  ;;  %v435_v8 = vld [vmem:[%s1914_s23 + $0x8] sm:$0xff]  ;;  %640 = vperm.xlu1 %1533, %v631_v50  }
  0x10   :  { %v1394_v9 = vmul.f32 -1.442695, %v434_v7  ;;  %v1395_v10 = vmul.f32 -1.442695, %v435_v8  ;;  %v71_v28 = vld [vmem:[%s1917_s1] sm:$0xff]  ;;  %v72_v29 = vld [vmem:[%s1917_s1 + $0x8] sm:$0xff] }
  0x11   :  { %1534 = vpow2.f32 %v1390_v5  ;;  %1464 = vmatprep.mubr.msk.f32.mxu1 %vm74_vm1, %v71_v28  ;;  %v1575_v8 = vmov 683565275  }
  0x12   :  { %663 = vperm.xlu0 %1532, %v654_v2   ;;  %1536 = vpow2.f32 %v1391_v6 }
  0x13   :  { %v532_v11 = vld [vmem:[%s1915_s26] sm:$0xff]  ;;  %1538 = vpow2.f32 %v1394_v9  ;;  %v533_v12 = vld [vmem:[%s1915_s26 + $0x8] sm:$0xff] }
  0x14   :  { %v1398_v13 = vmul.f32 -1.442695, %v532_v11  ;;  %1540 = vpow2.f32 %v1395_v10  ;;  %v1399_v14 = vmul.f32 -1.442695, %v533_v12  ;;  %v73_v27 = vld [vmem:[%s1916_s7] sm:$0x3] }
  0x15   :  { %1462 = vmatprep.subr.msk.mxu1 %vm81_vm0, %v73_v27  ;;  %v1576_v12 = vmov 2475754826  }
  0x16   :  { %1542 = vpow2.f32 %v1398_v13  ;;  %1463 = vmatpush3.msk.msra.mxu1 %vm81_vm0, %v73_v27 }
  0x17   :  { %1544 = vpow2.f32 %v1399_v14  ;;  %1465 = vmatmul.mubr.msk.f32.vlgmr.msra.gmra.mxu1 %vm74_vm1, %v72_v29  ;;  %1467 = vmatprep.subr.msk.mxu1 %vm167_vm2, %v70_v30  ;;  %v1577_v14 = vmov 2131351028  }
  0x18   :  { %1469 = vmatprep.mubr.msk.f32.mxu1 %vm160_vm3, %v68_v31  ;;  %1468 = vmatpush3.msk.msra.mxu1 %vm167_vm2, %v70_v30 }
  0x19   :  { %1477 = vmatprep.subr.mxu1 %v349_v36 }
  0x1b   :  { %1470 = vmatmul.mubr.msk.f32.vlgmr.msra.gmra.mxu1 %vm160_vm3, %v69_v32 }
  0x1c   :  { %1478 = vmatpush3.msra.mxu1 %v349_v36 }
  0x1d   :  { %1487 = vmatprep.subr.mxu1 %v546_v39 }
  0x1e   :  { %v1535_v15 = vpop.eup %1534 }
  0x1f   :  { %v1537_v16 = vpop.eup %1536  ;;  %v343_v17 = vadd.f32 1.0, %v1535_v15 }
  0x20   :  { %v1539_v18 = vpop.eup %1538  ;;  %v344_v19 = vadd.f32 1.0, %v1537_v16  ;;  %v1578_v16 = vmov 2102212464  }
  0x21   :  { %v1541_v20 = vpop.eup %1540  ;;  %1546 = vrcp.f32 %v343_v17  ;;  %v442_v21 = vadd.f32 1.0, %v1539_v18  ;;  %v1579_v18 = vmov 920167782  }
  0x22   :  { %1548 = vrcp.f32 %v344_v19  ;;  %v443_v23 = vadd.f32 1.0, %v1541_v20 }
  0x23   :  { %v1543_v22 = vpop.eup %1542  ;;  %1550 = vrcp.f32 %v442_v21 }
  0x24   :  { %v1545_v24 = vpop.eup %1544  ;;  %v540_v25 = vadd.f32 1.0, %v1543_v22  ;;  %1552 = vrcp.f32 %v443_v23 }
  0x25   :  { %v541_v26 = vadd.f32 1.0, %v1545_v24 }
  0x26   :  { %1554 = vrcp.f32 %v540_v25  ;;  %v1580_v25 = vmov 1326507024  }
  0x27   :  { %1556 = vrcp.f32 %v541_v26 }
  0x2e   :  { %v1547_v38 = vpop.eup %1546 }
  0x2f   :  { %v1549_v40 = vpop.eup %1548  ;;  %1479 = vmatprep.mubr.msk.f32.mxu1 %vm350_vm4, %v1547_v38 }
  0x30   :  { %v1551_v41 = vpop.eup %1550  ;;  %1480 = vmatmul.mubr.msk.f32.vlgmr.msra.gmra.mxu1 %vm350_vm4, %v1549_v40 }
  0x31   :  { %v1553_v43 = vpop.eup %1552  ;;  %1484 = vmatprep.mubr.msk.f32.mxu0 %vm350_vm4, %v1551_v41  ;;  %1488 = vmatpush3.msra.mxu1 %v546_v39 }
  0x32   :  { %1485 = vmatmul.mubr.msk.f32.vlgmr.msra.gmra.mxu0 %vm350_vm4, %v1553_v43  ;;  %1499 = vmatprep.subr.mxu1 %v881_v44 }
  0x33   :  { %v1555_v45 = vpop.eup %1554  ;;  %1493 = vmatpush3.msra.mxu0 %v1091_v42 }
  0x34   :  { %v1557_v46 = vpop.eup %1556  ;;  %1489 = vmatprep.mubr.msk.f32.mxu1 %vm350_vm4, %v1555_v45  ;;  %1494 = vmatprep.subr.mxu0 %v1090_v47 }
  0x35   :  { %1490 = vmatmul.mubr.msk.f32.vlgmr.msra.gmra.mxu1 %vm350_vm4, %v1557_v46  ;;  %1495 = vmatpush3.msra.mxu0 %v1090_v47 }
  0x36   :  { %1500 = vmatpush3.msra.mxu1 %v881_v44 }
  0x37   :  { %1501 = vmatprep.subr.mxu1 %v880_v48 }
  0x38   :  { %1502 = vmatpush3.msra.mxu1 %v880_v48 }
  0x89   :  { %v659_v52 = vpop.permute.xlu0 %658 }
  0x8a   :  { %v1788_v53 = vmul.f32 %v1403_v51, %v659_v52 }
  0x8c   :  { %v674_v54 = vand.u32 2147483647, %v1788_v53  ;;  %v677_v55 = vand.u32 2139095040, %v1788_v53  ;;  %vm676_vm3 = vcmp.lt.s32.totalorder %v1788_v53, 0 }
  0x8d   :  { %v664_v56 = vpop.permute.xlu0 %663 }
  0x8e   :  { %v678_v57 = vshrl.u32 %v677_v55, 23  ;;  %v1792_v58 = vmul.f32 %v1403_v51, %v664_v56  ;;  %v681_v59 = vand.u32 8388607, %v674_v54  ;;  %vm675_vm4 = vcmp.le.f32.partialorder %v674_v54, 0.7853982 }
  0x90   :  { %v1404_v60 = vadd.s32 4294967169, %v678_v57  ;;  %v780_v61 = vand.u32 2139095040, %v1792_v58  ;;  %v682_v63 = vor.u32 8388608, %v681_v59  ;;  %v777_v1 = vand.u32 2147483647, %v1792_v58 }
  0x92   :  { %v684_v62 = vadd.s32 1, %v1404_v60  ;;  %v781_v0 = vshrl.u32 %v780_v61, 23  ;;  %v1798_v6 = vshll.u32 %v682_v63, 8  ;;  %v784_v10 = vand.u32 8388607, %v777_v1 }
  0x94   :  { %vm685_vm5 = vcmp.gt.s32.totalorder %v684_v62, 0  ;;  %v1408_v3 = vadd.s32 4294967169, %v781_v0  ;;  %v785_v40 = vor.u32 8388608, %v784_v10 }
  0x95   :  { %v686_v2 = vsel %vm685_vm5, %v684_v62, 0  ;;  %vm779_vm5 = vcmp.lt.s32.totalorder %v1792_v58, 0 }
  0x96   :  { %v687_v4 = vshrl.u32 %v686_v2, 5  ;;  %v688_v5 = vand.u32 31, %v686_v2  ;;  %v787_v11 = vadd.s32 1, %v1408_v3  ;;  %v825_v55 = vshll.u32 %v785_v40, 8 }
  0x98   :  { %v689_v7 = vsub.s32 32, %v688_v5  ;;  %v691_v9 = vshll.u32 %v1575_v8, %v688_v5  ;;  %v694_v13 = vshll.u32 %v1576_v12, %v688_v5  ;;  %v697_v15 = vshll.u32 %v1577_v14, %v688_v5 }
  0x99   :  { %v700_v17 = vshll.u32 %v1578_v16, %v688_v5  ;;  %v703_v19 = vshll.u32 %v1579_v18, %v688_v5  ;;  %vm706_vm6 = vcmp.lt.s32.totalorder %v687_v4, 1  ;;  %vm708_vm7 = vcmp.lt.s32.totalorder %v687_v4, 3 }
  0x9a   :  { %v692_v20 = vshrl.u32 %v1576_v12, %v689_v7  ;;  %v695_v21 = vshrl.u32 %v1577_v14, %v689_v7  ;;  %v698_v22 = vshrl.u32 %v1578_v16, %v689_v7  ;;  %v690_v23 = vshrl.u32 %v1575_v8, %v689_v7 }
  0x9b   :  { %v701_v24 = vshrl.u32 %v1579_v18, %v689_v7  ;;  %v704_v26 = vshrl.u32 %v1580_v25, %v689_v7  ;;  %vm788_vm8 = vcmp.gt.s32.totalorder %v787_v11, 0  ;;  %vm709_vm9 = vcmp.lt.s32.totalorder %v687_v4, 4 }
  0x9c   :  { %v693_v27 = vor.u32 %v692_v20, %v691_v9  ;;  %v696_v28 = vor.u32 %v695_v21, %v694_v13  ;;  %v699_v29 = vor.u32 %v698_v22, %v697_v15  ;;  %v789_v32 = vsel %vm788_vm8, %v787_v11, 0 }
  0x9d   :  { %v702_v30 = vor.u32 %v701_v24, %v700_v17  ;;  %v705_v31 = vor.u32 %v704_v26, %v703_v19  ;;  %vm707_vm10 = vcmp.lt.s32.totalorder %v687_v4, 2  ;;  %v791_v43 = vand.u32 31, %v789_v32 }
  0x9e   :  { %v710_v33 = vsel %vm706_vm6, %v690_v23, %v693_v27  ;;  %v711_v34 = vsel %vm709_vm9, %v699_v29, 2102212464  ;;  %v714_v35 = vsel %vm706_vm6, %v693_v27, %v696_v28  ;;  %v718_v36 = vsel %vm706_vm6, %v696_v28, %v699_v29 }
  0x9f   :  { %v712_v37 = vsel %vm708_vm7, %v696_v28, %v711_v34  ;;  %v715_v38 = vsel %vm709_vm9, %v702_v30, 920167782  ;;  %v719_v39 = vsel %vm709_vm9, %v705_v31, 1326507024  ;;  %v790_v51 = vshrl.u32 %v789_v32, 5 }
  0xa0   :  { %v716_v41 = vsel %vm708_vm7, %v699_v29, %v715_v38  ;;  %v720_v42 = vsel %vm708_vm7, %v702_v30, %v719_v39  ;;  %v713_v44 = vsel %vm707_vm10, %v710_v33, %v712_v37  ;;  %v792_v52 = vsub.s32 32, %v791_v43 }
  0xa1   :  { %v717_v45 = vsel %vm707_vm10, %v714_v35, %v716_v41  ;;  %v721_v46 = vsel %vm707_vm10, %v718_v36, %v720_v42  ;;  %v729_v56 = vmul.u32 %v1798_v6, %v713_v44  ;;  %v794_v57 = vshll.u32 %v1575_v8, %v791_v43 }
  0xa2   :  { %v1811_v47 = vmul.u32.u64.low %v1798_v6, %v721_v46  ;;  %v1812_v48 = vmul.u32.u64.high %v1798_v6, %v721_v46, %v1811_v47  ;;  %v1815_v49 = vmul.u32.u64.low %v1798_v6, %v717_v45  ;;  %v1816_v50 = vmul.u32.u64.high %v1798_v6, %v717_v45, %v1815_v49 }
  0xa3   :  { %v797_v59 = vshll.u32 %v1576_v12, %v791_v43  ;;  %v800_v60 = vshll.u32 %v1577_v14, %v791_v43  ;;  %v795_v61 = vshrl.u32 %v1576_v12, %v792_v52  ;;  %v798_v62 = vshrl.u32 %v1577_v14, %v792_v52 }
  0xa4   :  { %v801_v63 = vshrl.u32 %v1578_v16, %v792_v52  ;;  %v803_v0 = vshll.u32 %v1578_v16, %v791_v43  ;;  %vm731_vm11 = vc.u32 %v1812_v48, %v1815_v49  ;;  %v732_v2 = vadd.s32 1, %v1816_v50 }
  0xa5   :  { %v804_v3 = vshrl.u32 %v1579_v18, %v792_v52  ;;  %v806_v4 = vshll.u32 %v1579_v18, %v791_v43  ;;  %v796_v5 = vor.u32 %v795_v61, %v794_v57  ;;  %v799_v7 = vor.u32 %v798_v62, %v797_v59 }
  0xa6   :  { %v802_v9 = vor.u32 %v801_v63, %v800_v60  ;;  %v807_v10 = vshrl.u32 %v1580_v25, %v792_v52  ;;  %v733_v6 = vsel %vm731_vm11, %v732_v2, %v1816_v50  ;;  %vm809_vm12 = vcmp.lt.s32.totalorder %v790_v51, 1 }
  0xa7   :  { %v805_v11 = vor.u32 %v804_v3, %v803_v0  ;;  %vm812_vm13 = vcmp.lt.s32.totalorder %v790_v51, 4  ;;  %v734_v12 = vadd.s32 %v733_v6, %v729_v56  ;;  %vm811_vm14 = vcmp.lt.s32.totalorder %v790_v51, 3 }
  0xa8   :  { %v808_v13 = vor.u32 %v807_v10, %v806_v4  ;;  %v814_v14 = vsel %vm812_vm13, %v802_v9, 2102212464  ;;  %v793_v15 = vshrl.u32 %v1575_v8, %v792_v52  ;;  %v817_v16 = vsel %vm809_vm12, %v796_v5, %v799_v7 }
  0xa9   :  { %v818_v17 = vsel %vm812_vm13, %v805_v11, 920167782  ;;  %v821_v19 = vsel %vm809_vm12, %v799_v7, %v802_v9  ;;  %v735_v20 = vadd.s32 536870912, %v734_v12  ;;  %vm810_vm15 = vcmp.lt.s32.totalorder %v790_v51, 2 }
  0xaa   :  { %v819_v18 = vsel %vm811_vm14, %v802_v9, %v818_v17  ;;  %v822_v21 = vsel %vm812_vm13, %v808_v13, 1326507024  ;;  %v813_v22 = vsel %vm809_vm12, %v793_v15, %v796_v5  ;;  %v815_v23 = vsel %vm811_vm14, %v799_v7, %v814_v14 }
  0xab   :  { %v820_v24 = vsel %vm810_vm15, %v817_v16, %v819_v18  ;;  %v823_v25 = vsel %vm811_vm14, %v805_v11, %v822_v21  ;;  %v736_v26 = vshrl.u32 %v735_v20, 30  ;;  %v816_v32 = vsel %vm810_vm15, %v813_v22, %v815_v23 }
  0xac   :  { %v824_v27 = vsel %vm810_vm15, %v821_v19, %v823_v25  ;;  %v1826_v28 = vmul.u32.u64.low %v825_v55, %v820_v24  ;;  %v1827_v29 = vmul.u32.u64.high %v825_v55, %v820_v24, %v1826_v28  ;;  %v832_v35 = vmul.u32 %v825_v55, %v816_v32 }
  0xad   :  { %v1829_v30 = vmul.u32.u64.low %v825_v55, %v824_v27  ;;  %v1830_v31 = vmul.u32.u64.high %v825_v55, %v824_v27, %v1829_v30  ;;  %v737_v8 = vshll.u32 %v736_v26, 30  ;;  %v730_v47 = vadd.s32 %v1815_v49, %v1812_v48 }
  0xae   :  { %v835_v34 = vadd.s32 1, %v1827_v29  ;;  %vm778_vm6 = vcmp.le.f32.partialorder %v777_v1, 0.7853982  ;;  %vm1092_vm7 = vcmask 130048   ;;  %vm766_vm14 = vweird.f32 %v1788_v53 }
  0xaf   :  { %v738_v33 = vsub.s32 %v734_v12, %v737_v8  ;;  %vm834_vm0 = vc.u32 %v1830_v31, %v1826_v28  ;;  %v833_v7 = vadd.s32 %v1826_v28, %v1830_v31  ;;  %v760_v12 = vsub.s32 4, %v736_v26 }
  0xb0   :  { %v836_v37 = vsel %vm834_vm0, %v835_v34, %v1827_v29 }
  0xb1   :  { %v740_v36 = vsub.s32 0, %v738_v33  ;;  %v837_v38 = vadd.s32 %v836_v37, %v832_v35  ;;  %v761_v19 = vsel %vm676_vm3, %v760_v12, %v736_v26 }
  0xb2   :  { %v763_v21 = vsel %vm675_vm4, 0, %v761_v19 }
  0xb3   :  { %v1405_v39 = vmin.u32 %v740_v36, %v738_v33  ;;  %v838_v40 = vadd.s32 536870912, %v837_v38  ;;  %v975_v24 = vadd.s32 3, %v763_v21  ;;  %v767_v29 = vand.u32 3, %v763_v21  ;;  %v1424_v21 = vld [vmem:[%s1897_s18] ss:$0 sm:$0xff] }
  0xb5   :  { %v742_v41 = vclz %v1405_v39  ;;  %v839_v42 = vshrl.u32 %v838_v40, 30  ;;  %v976_v28 = vand.u32 3, %v975_v24  ;;  %vm772_vm9 = vcmp.eq.s32.totalorder %v767_v29, 2 }
  0xb6   :  { %vm769_vm11 = vcmp.eq.s32.totalorder %v767_v29, 0  ;;  %vm768_vm13 = vcmp.lt.s32.totalorder %v767_v29, 2 }
  0xb7   :  { %v1406_v43 = vadd.s32 4294967294, %v742_v41  ;;  %v840_v44 = vshll.u32 %v839_v42, 30  ;;  %v863_v25 = vsub.s32 4, %v839_v42  ;;  %vm981_vm8 = vcmp.eq.s32.totalorder %v976_v28, 2 }
  0xb8   :  { %vm978_vm10 = vcmp.eq.s32.totalorder %v976_v28, 0  ;;  %vm977_vm12 = vcmp.lt.s32.totalorder %v976_v28, 2 }
  0xb9   :  { %vm1407_vm1 = vcmp.lt.s32.totalorder %v1406_v43, 0  ;;  %v841_v46 = vsub.s32 %v837_v38, %v840_v44  ;;  %v864_v30 = vsel %vm779_vm5, %v863_v25, %v839_v42 }
  0xba   :  { %v745_v45 = vsel %vm1407_vm1, 0, %v1406_v43 }
  0xbb   :  { %v746_v50 = vsub.s32 32, %v745_v45  ;;  %v750_v51 = vsub.s32 4294967266, %v745_v45  ;;  %v843_v52 = vsub.s32 0, %v841_v46  ;;  %v747_v55 = vshll.u32 %v738_v33, %v745_v45 }
  0xbc   :  { %v866_v33 = vsel %vm778_vm6, 0, %v864_v30 }
  0xbd   :  { %v748_v56 = vshrl.u32 %v730_v47, %v746_v50  ;;  %v751_v57 = vadd.s32 127, %v750_v51  ;;  %v1409_v59 = vmin.u32 %v843_v52, %v841_v46  ;;  %v1079_v39 = vadd.s32 3, %v866_v33 }
  0xbe   :  { %v870_v43 = vand.u32 3, %v866_v33 }
  0xbf   :  { %v749_v60 = vor.u32 %v748_v56, %v747_v55  ;;  %v752_v61 = vshll.u32 %v751_v57, 23  ;;  %v845_v62 = vclz %v1409_v59  ;;  %v1080_v42 = vand.u32 3, %v1079_v39 }
  0xc0   :  { %vm875_vm0 = vcmp.eq.s32.totalorder %v870_v43, 2 }
  0xc1   :  { %v753_v63 = vor.u32 4788187, %v752_v61  ;;  %v1410_v0 = vadd.s32 4294967294, %v845_v62  ;;  %v756_v3 = vcvt.s32.f32 %v749_v60  ;;  %vm1085_vm15 = vcmp.eq.s32.totalorder %v1080_v42, 2 }
  0xc2   :  { %vm1082_vm1 = vcmp.eq.s32.totalorder %v1080_v42, 0 }
  0xc3   :  { %v754_v2 = vand.u32 2147483647, %v753_v63  ;;  %vm1411_vm2 = vcmp.lt.s32.totalorder %v1410_v0, 0 }
  0xc4   :  { %v848_v5 = vsel %vm1411_vm2, 0, %v1410_v0  ;;  %vm872_vm2 = vcmp.eq.s32.totalorder %v870_v43, 0 }
  0xc5   :  { %v757_v4 = vmul.f32 %v756_v3, %v754_v2  ;;  %v849_v48 = vsub.s32 32, %v848_v5  ;;  %v853_v49 = vsub.s32 4294967266, %v848_v5  ;;  %v850_v10 = vshll.u32 %v841_v46, %v848_v5 }
  0xc6   :  { %v1476_v2 = vpop.f32.mrf.mxu0 }
  0xc7   :  { %v758_v9 = vxor.u32 2147483648, %v757_v4  ;;  %v851_v6 = vshrl.u32 %v833_v7, %v849_v48  ;;  %v854_v11 = vadd.s32 127, %v853_v49 }
  0xc8   :  { %v324_v5 = vpop.f32.mrf.mxu0 }
  0xc9   :  { %v759_v13 = vsel %vm676_vm3, %v758_v9, %v757_v4  ;;  %v852_v15 = vor.u32 %v851_v6, %v850_v10  ;;  %v855_v16 = vshll.u32 %v854_v11, 23  ;;  %vm1081_vm3 = vcmp.lt.s32.totalorder %v1080_v42, 2 }
  0xca   :  { %v762_v14 = vsel %vm675_vm4, %v1788_v53, %v759_v13  ;;  %vm871_vm4 = vcmp.lt.s32.totalorder %v870_v43, 2  ;;  %v1281_v13 = vld [vmem:[%s1896_s19 + $0x18] sm:$0xff] }
  0xcb   :  { %1558 = vcosq.f32 %v762_v14  ;;  %v856_v17 = vor.u32 4788187, %v855_v16  ;;  %v859_v18 = vcvt.s32.f32 %v852_v15  ;;  %1506 = vmatprep.subr.mxu0 %v1281_v13  ;;  %v1279_v15 = vld [vmem:[%s1896_s19 + $0x8] sm:$0xff]  ;;  %v1278_v16 = vld [vmem:[%s1896_s19] sm:$0xff] }
  0xcc   :  { %1560 = vsinq.f32 %v762_v14  ;;  %v1280_v14 = vld [vmem:[%s1896_s19 + $0x10] sm:$0xff] }
  0xcd   :  { %v857_v20 = vand.u32 2147483647, %v856_v17 }
  0xcf   :  { %v860_v22 = vmul.f32 %v859_v18, %v857_v20 }
  0xd1   :  { %v861_v23 = vxor.u32 2147483648, %v860_v22 }
  0xd3   :  { %v862_v54 = vsel %vm779_vm5, %v861_v23, %v860_v22  ;;  %vm869_vm5 = vweird.f32 %v1792_v58 }
  0xd4   :  { %v865_v27 = vsel %vm778_vm6, %v1792_v58, %v862_v54  ;;  %vm1282_vm6 = vcmask 261120  }
  0xd5   :  { %1562 = vcosq.f32 %v865_v27 }
  0xd6   :  { %1564 = vsinq.f32 %v865_v27 }
  0xd7   :  { %v1466_v60 = vpop.f32.mrf.mxu1 }
  0xd8   :  { %v1559_v26 = vpop.eup %1558 }
  0xd9   :  { %v1561_v31 = vpop.eup %1560  ;;  %v773_v8 = vxor.u32 2147483648, %v1559_v26  ;;  %v151_v61 = vpop.f32.mrf.mxu1 }
  0xda   :  { %v770_v32 = vxor.u32 2147483648, %v1561_v31 }
  0xdb   :  { %v983_v34 = vsel %vm981_vm8, %v773_v8, %v1561_v31  ;;  %v774_v1 = vsel %vm772_vm9, %v773_v8, %v1561_v31  ;;  %v1471_v62 = vpop.f32.mrf.mxu1 }
  0xdc   :  { %v980_v35 = vsel %vm978_vm10, %v1559_v26, %v770_v32  ;;  %v771_v36 = vsel %vm769_vm11, %v1559_v26, %v770_v32  ;;  %v243_v63 = vadd.f32 %v1471_v62, %v1466_v60 }
  0xdd   :  { %v984_v37 = vsel %vm977_vm12, %v980_v35, %v983_v34  ;;  %v775_v38 = vsel %vm768_vm13, %v771_v36, %v774_v1  ;;  %v237_v0 = vpop.f32.mrf.mxu1  ;;  %v636_v35 = vpop.permute.xlu1 %635  ;;  %v1402_v36 = vld [vmem:[%s1898_s15] ss:$0 sm:$0xff] }
  0xde   :  { %v985_v40 = vsel %vm766_vm14, nan, %v984_v37  ;;  %v776_v41 = vsel %vm766_vm14, nan, %v775_v38  ;;  %v238_v3 = vadd.f32 %v237_v0, %v151_v61  ;;  %v334_v4 = vadd.f32 %v1476_v2, %v243_v63 }
  0xdf   :  { %1496 = vmatprep.mubr.msk.f32.mxu0 %vm1092_vm7, %v985_v40  ;;  %1503 = vmatprep.mubr.msk.f32.mxu1 %vm1092_vm7, %v776_v41  ;;  %v649_v40 = vmul.f32 %v1402_v36, %v636_v35 }
  0xe0   :  { %v333_v48 = vadd.f32 %v324_v5, %v238_v3 }
  0xe1   :  { %v641_v37 = vpop.permute.xlu1 %640 }
  0xe2   :  { %v1563_v44 = vpop.eup %1562  ;;  %v650_v39 = vmul.f32 %v1402_v36, %v641_v37 }
  0xe3   :  { %v1565_v45 = vpop.eup %1564  ;;  %v876_v46 = vxor.u32 2147483648, %v1563_v44 }
  0xe4   :  { %v873_v47 = vxor.u32 2147483648, %v1565_v45 }
  0xe5   :  { %v1087_v50 = vsel %vm1085_vm15, %v876_v46, %v1565_v45  ;;  %v877_v53 = vsel %vm875_vm0, %v876_v46, %v1565_v45 }
  0xe6   :  { %v1084_v51 = vsel %vm1082_vm1, %v1563_v44, %v873_v47  ;;  %v874_v52 = vsel %vm872_vm2, %v1563_v44, %v873_v47  ;;  %v1429_v44 = vld [vmem:[%s1899_s20] ss:$0 sm:$0xff] }
  0xe7   :  { %v1088_v55 = vsel %vm1081_vm3, %v1084_v51, %v1087_v50  ;;  %v878_v56 = vsel %vm871_vm4, %v874_v52, %v877_v53 }
  0xe8   :  { %v1089_v57 = vsel %vm869_vm5, nan, %v1088_v55  ;;  %v879_v59 = vsel %vm869_vm5, nan, %v878_v56 }
  0xe9   :  { %1497 = vmatmul.mubr.msk.f32.vlgmr.msra.gmra.mxu0 %vm1092_vm7, %v1089_v57  ;;  %1504 = vmatmul.mubr.msk.f32.vlgmr.msra.gmra.mxu1 %vm1092_vm7, %v879_v59 }
  0xea   :  { %1507 = vmatpush3.msra.mxu0 %v1281_v13 }
  0xeb   :  { %1508 = vmatprep.subr.mxu0 %v1280_v14 }
  0xec   :  { %1509 = vmatpush3.msra.mxu0 %v1280_v14 }
  0xed   :  { %1510 = vmatprep.subr.mxu0 %v1279_v15 }
  0xee   :  { %1511 = vmatpush3.msra.mxu0 %v1279_v15 }
  0xef   :  { %1512 = vmatprep.subr.mxu0 %v1278_v16 }
  0xf0   :  { %v1481_v7 = vpop.f32.mrf.mxu1  ;;  %1513 = vmatpush3.msra.mxu0 %v1278_v16 }
  0xf1   :  { %v433_v58 = vadd.f32 %v1481_v7, %v334_v4 }
  0xf2   :  { %v423_v49 = vpop.f32.mrf.mxu1  ;;  %v1486_v9 = vpop.f32.mrf.mxu0 }
  0xf3   :  { %v432_v10 = vadd.f32 %v423_v49, %v333_v48  ;;  %v531_v6 = vadd.f32 %v1486_v9, %v433_v58 }
  0xf4   :  { %v521_v17 = vpop.f32.mrf.mxu0 }
  0xf5   :  { %v1491_v11 = vpop.f32.mrf.mxu1  ;;  %v530_v38 = vadd.f32 %v521_v17, %v432_v10 }
  0xf6   :  { %v629_v12 = vadd.f32 %v1491_v11, %v531_v6 }
  0xf7   :  { %v619_v19 = vpop.f32.mrf.mxu1 }
  0xf8   :  { %v628_v41 = vadd.f32 %v619_v19, %v530_v38  ;;  %v652_v42 = vadd.f32 %v650_v39, %v629_v12 }
  0xfa   :  { %v651_v46 = vadd.f32 %v649_v40, %v628_v41 }
 0x1a9   :  { %v1498_v20 = vpop.f32.mrf.mxu0  ;;  %v1505_v18 = vpop.f32.mrf.mxu1 }
 0x1aa   :  { %v1252_v22 = vadd.f32 %v1505_v18, %v1498_v20 }
 0x1ab   :  { %v1165_v23 = vpop.f32.mrf.mxu0  ;;  %v1246_v24 = vpop.f32.mrf.mxu1 }
 0x1ac   :  { %v1263_v25 = vadd.f32 %v1424_v21, %v1252_v22  ;;  %v1247_v54 = vadd.f32 %v1246_v24, %v1165_v23 }
 0x1ae   :  { %v1426_v27 = vmul.f32 -1.442695, %v1263_v25  ;;  %v1262_v28 = vadd.f32 %v1424_v21, %v1247_v54 }
 0x1b0   :  { %1566 = vpow2.f32 %v1426_v27  ;;  %v1425_v29 = vmul.f32 -1.442695, %v1262_v28 }
 0x1b2   :  { %1568 = vpow2.f32 %v1425_v29 }
 0x1bd   :  { %v1567_v30 = vpop.eup %1566 }
 0x1be   :  { %v1271_v26 = vadd.f32 1.0, %v1567_v30 }
 0x1bf   :  { %v1569_v31 = vpop.eup %1568 }
 0x1c0   :  { %v1270_v8 = vadd.f32 1.0, %v1569_v31  ;;  %1570 = vrcp.f32 %v1271_v26 }
 0x1c2   :  { %1572 = vrcp.f32 %v1270_v8 }
 0x1cd   :  { %v1571_v32 = vpop.eup %1570 }
 0x1ce   :  { %v1277_v1 = vmul.f32 %v1571_v32, %v1263_v25 }
 0x1cf   :  { %v1573_v33 = vpop.eup %1572 }
 0x1d0   :  { %v1276_v34 = vmul.f32 %v1573_v33, %v1262_v28 }
 0x1d2   :  { %1514 = vmatprep.mubr.msk.f32.mxu0 %vm1282_vm6, %v1276_v34 }
 0x1d3   :  { %1515 = vmatmul.mubr.msk.f32.vlgmr.msra.gmra.mxu0 %vm1282_vm6, %v1277_v1 }
 0x293   :  { %v1516_v43 = vpop.f32.mrf.mxu0 }
 0x294   :  { %v1365_v45 = vadd.f32 %v1516_v43, %v652_v42 }
 0x295   :  { %v1355_v47 = vpop.f32.mrf.mxu0 }
 0x296   :  { %v1374_v50 = vadd.f32 %v1429_v44, %v1365_v45  ;;  %v1364_v53 = vadd.f32 %v1355_v47, %v651_v46 }
 0x298   :  { %1376 = vst [vmem:[%s1900_s21 + $0x8] sm:$0xff] %v1374_v50  ;;  %v1373_v51 = vadd.f32 %v1429_v44, %v1364_v53 }
 0x29a   :  { %1375 = vst [vmem:[%s1900_s21] sm:$0xff] %v1373_v51 }

</bundles_post_ra>
